<compile_context>
chip_gen: v7x
topology: tpu7x:2x2x1
jax: 0.10.0
libtpu: 0.0.40
codegen_flags: <defaults>
</compile_context>

<pallas_src>
import functools

import jax
import jax.numpy as jnp
from jax.experimental import pallas as pl
from jax.experimental.pallas import tpu as pltpu


# TODO(synk): the torch module accepts arbitrary activation callables in
# h_specs; here only named activations (relu/tanh/sigmoid/None) are supported.
_ACTS = {
    None: None,
    "relu": lambda x: jnp.maximum(x, 0.0),
    "tanh": jnp.tanh,
    "sigmoid": jax.nn.sigmoid,
}


def _round_up(x, m):
    return ((x + m - 1) // m) * m


def _pack_params(params):
    """Pack all layers into one f32 slab.

    params: list of (W, b) with torch layout W=(out, in), b=(out,).
    Each layer occupies rows [row, row+out) holding [W | b] in columns
    [0, in+1); row starts are aligned to 8 sublanes so in-kernel slices stay
    tile-aligned for arbitrary widths.
    Returns (slab, meta) with meta = tuple of (row_start, out_dim, in_dim).
    """
    meta = []
    r = 0
    for w, _ in params:
        out_d, in_d = int(w.shape[0]), int(w.shape[1])
        meta.append((r, out_d, in_d))
        r = _round_up(r + out_d, 8)            # sublane-align next layer
    rows_pad = _round_up(max(r, 8), 8)
    cols = max(int(w.shape[1]) + 1 for w, _ in params)
    cols_pad = _round_up(cols, 128)

    slab = jnp.zeros((rows_pad, cols_pad), jnp.float32)
    for (row, out_d, in_d), (w, b) in zip(meta, params):
        aug = jnp.concatenate(
            [w.astype(jnp.float32), b.astype(jnp.float32)[:, None]], axis=1)
        slab = slab.at[row:row + out_d, 0:in_d + 1].set(aug)
    return slab, tuple(meta)


def _encoder_kernel(x_ref, p_ref, out_ref, acc_ref, *,
                    layer_meta, acts, n_true, block_n):
    """One tile of context columns through the MLP, accumulate masked sum.

    x_ref   : (D, block_n)          one tile of xy_context (feature-major)
    p_ref   : (rows_pad, cols_pad)  packed [W | b] parameter slab (resident)
    out_ref : (out_dim, 1)          final mean, written only in the epilogue
    acc_ref : (out_dim, 128)        resident f32 lane-parallel accumulator
    """
    i = pl.program_id(0)
    last = pl.num_programs(0) - 1

    @pl.when(i == 0)
    def _init():
        acc_ref[...] = jnp.zeros_like(acc_ref)

    # MLP, feature-major: h is (out_d, block_n) at every stage.
    h = x_ref[...].astype(jnp.float32)                     # (D, block_n)
    for (row, out_d, in_d), act_name in zip(layer_meta, acts):
        w = p_ref[row:row + out_d, 0:in_d]                 # (out_d, in_d)
        b = p_ref[row:row + out_d, in_d:in_d + 1]          # (out_d, 1)
        h = jnp.dot(w, h, preferred_element_type=jnp.float32) + b
        act = _ACTS[act_name]
        if act is not None:
            h = act(h)

    def _accumulate(hv):
        # Deferred reduction: fold the block_n lanes down to 128 lanes with
        # pure VPU adds; the cross-lane XLU reduce happens once, at the end.
        partial = hv[:, 0:128]
        for j in range(1, block_n // 128):
            partial = partial + hv[:, j * 128:(j + 1) * 128]
        acc_ref[...] += partial

    @pl.when(i != last)
    def _acc_full():
        _accumulate(h)                                     # full tile: no mask

    @pl.when(i == last)
    def _acc_tail_and_finalize():
        # Mask padded context columns (lanes) of the last tile only.
        col = jax.lax.broadcasted_iota(jnp.int32, h.shape, 1) + i * block_n
        _accumulate(jnp.where(col < n_true, h, 0.0))
        # Single cross-lane reduce + divide by the true N, store the mean.
        out_ref[...] = (jnp.sum(acc_ref[...], axis=1, keepdims=True)
                        * jnp.float32(1.0 / n_true))


def encoder_forward(xy_context, params, acts, *, block_n=None):
    """xy_context: (N, input_dim) array.
    params: list of (W, b) with torch layout W=(out, in), b=(out,).
    acts:   tuple of activation names ('relu', 'tanh', 'sigmoid', or None).
    Returns r = mean over context points, shape (out_dim,)."""
    n, d = xy_context.shape
    if n == 0:
        raise ValueError("encoder_forward: empty context (mean undefined)")
    out_dim = int(params[-1][0].shape[0])

    if block_n is None:
        block_n = min(8192, _round_up(n, 128))
    block_n = max(128, _round_up(block_n, 128))

    n_pad = _round_up(n, block_n)
    # Feature-major (D, N) input: lane-dense DMA/loads and a plain MXU matmul
    # for layer 0.  One XLA transpose in the wrapper.
    xt = jnp.asarray(xy_context, jnp.float32).T            # (d, n)
    if n_pad != n:
        xt = jnp.pad(xt, ((0, 0), (0, n_pad - n)))
    num_blocks = n_pad // block_n

    slab, layer_meta = _pack_params(params)

    kernel = functools.partial(
        _encoder_kernel,
        layer_meta=layer_meta, acts=tuple(acts), n_true=n, block_n=block_n)

    out = pl.pallas_call(
        kernel,
        out_shape=jax.ShapeDtypeStruct((out_dim, 1), jnp.float32),
        grid=(num_blocks,),
        in_specs=[
            pl.BlockSpec((d, block_n), lambda i: (0, i)),        # tiled context
            pl.BlockSpec(slab.shape, lambda i: (0, 0)),          # resident params
        ],
        out_specs=pl.BlockSpec((out_dim, 1), lambda i: (0, 0)),  # epilogue-only
        scratch_shapes=[pltpu.VMEM((out_dim, 128), jnp.float32)],
        compiler_params=pltpu.CompilerParams(
            dimension_semantics=("arbitrary",)),                 # reduction axis
    )(xt, slab)
    return out[:, 0]


def _reference_forward(xy_context, params, acts):
    r = xy_context.astype(jnp.float32)
    for (w, b), act_name in zip(params, acts):
        r = r @ w.T + b
        act = _ACTS[act_name]
        if act is not None:
            r = act(r)
    return r.mean(axis=0)


if __name__ == "__main__":
    # Module configuration: input_dim features+labels per example,
    # h_specs = [(32, ReLU), (32, ReLU), (64, None)]
    input_dim = 4
    h_specs = [(32, "relu"), (32, "relu"), (64, None)]
    acts = tuple(a for _, a in h_specs)

    key = jax.random.PRNGKey(0)
    k_x, k_p = jax.random.split(key)

    # Deterministic parameter init: weights ~ normal (init_func=normal_),
    # biases torch-default uniform(-1/sqrt(in), 1/sqrt(in)).  Torch layout.
    params = []
    prev = input_dim
    for width, _ in h_specs:
        k_p, kw, kb = jax.random.split(k_p, 3)
        w = jax.random.normal(kw, (width, prev), dtype=jnp.float32)
        bound = 1.0 / float(jnp.sqrt(jnp.float32(prev)))
        b = jax.random.uniform(kb, (width,), dtype=jnp.float32,
                               minval=-bound, maxval=bound)
        params.append((w, b))
        prev = width

    # Case 1: N not a multiple of the tile, forced small tile -> multi-step
    # grid exercises accumulation, pl.when-guarded tail masking, finalize.
    n_context = 200
    xy_context = jax.random.normal(k_x, (n_context, input_dim), dtype=jnp.float32)
    r = jax.block_until_ready(encoder_forward(xy_context, params, acts, block_n=128))
    r_ref = _reference_forward(xy_context, params, acts)
    assert r.shape == (h_specs[-1][0],)
    assert jnp.allclose(r, r_ref, atol=1e-3, rtol=1e-4), (r, r_ref)

    # Case 2: tiny N with default tiling (single step, heavy lane padding).
    xy_small = xy_context[:8]
    r2 = jax.block_until_ready(encoder_forward(xy_small, params, acts))
    r2_ref = _reference_forward(xy_small, params, acts)
    assert jnp.allclose(r2, r2_ref, atol=1e-3, rtol=1e-4), (r2, r2_ref)

    # Case 3: multi-block path with a mid-size tile (4 grid steps + ragged tail).
    k_x2, _ = jax.random.split(k_x)
    xy_big = jax.random.normal(k_x2, (1000, input_dim), dtype=jnp.float32)
    r3 = jax.block_until_ready(encoder_forward(xy_big, params, acts, block_n=256))
    r3_ref = _reference_forward(xy_big, params, acts)
    assert jnp.allclose(r3, r3_ref, atol=1e-3, rtol=1e-4), (r3, r3_ref)

    print("KERNEL_OK")
</pallas_src>

<mosaic_0001>
module attributes {stable_mosaic.version = 11 : i64} {
  func.func @_encoder_kernel(%arg0: i32, %arg1: memref<4x128xf32, #tpu.memory_space<vmem>>, %arg2: memref<128x128xf32, #tpu.memory_space<vmem>>, %arg3: memref<64x1xf32, #tpu.memory_space<vmem>>, %arg4: memref<64x128xf32, #tpu.memory_space<vmem>>) attributes {dimension_semantics = [#tpu.dimension_semantics<arbitrary>], iteration_bounds = array<i64: 2>, scalar_prefetch = 0 : i64, scratch_operands = 1 : i64, tpu.core_type = #tpu.core_type<tc>, window_params = [{transform_indices = @transform_0, window_bounds = array<i64: 4, 128>}, {pipeline_mode = #tpu.pipeline_mode<synchronous>, transform_indices = @transform_1, window_bounds = array<i64: 128, 128>}, {pipeline_mode = #tpu.pipeline_mode<synchronous>, transform_indices = @transform_2, window_bounds = array<i64: 64, 1>}]} {
    %c0_i32 = arith.constant 0 : i32
    %0 = arith.cmpi eq, %arg0, %c0_i32 : i32
    %1 = arith.extui %0 : i1 to i32
    %c0_i32_0 = arith.constant 0 : i32
    %2 = arith.cmpi ne, %1, %c0_i32_0 : i32
    scf.if %2 {
      %cst_18 = arith.constant 0.000000e+00 : f32
      %29 = vector.broadcast %cst_18 : f32 to vector<64x128xf32>
      %c0_19 = arith.constant 0 : index
      %c0_20 = arith.constant 0 : index
      %30 = vector.load %arg4[%c0_19, %c0_20] : memref<64x128xf32, #tpu.memory_space<vmem>>, vector<64x128xf32>
      tpu.vector_store %arg4[%c0_19, %c0_20], %29 {strides = array<i32>} : memref<64x128xf32, #tpu.memory_space<vmem>>, vector<64x128xf32>,
    } else {
    }
    %c0 = arith.constant 0 : index
    %c0_1 = arith.constant 0 : index
    %3 = vector.load %arg1[%c0, %c0_1] : memref<4x128xf32, #tpu.memory_space<vmem>>, vector<4x128xf32>
    %c0_2 = arith.constant 0 : index
    %c0_3 = arith.constant 0 : index
    %4 = vector.load %arg2[%c0_2, %c0_3] : memref<128x128xf32, #tpu.memory_space<vmem>>, vector<32x4xf32>
    %c0_4 = arith.constant 0 : index
    %c4 = arith.constant 4 : index
    %5 = vector.load %arg2[%c0_4, %c4] : memref<128x128xf32, #tpu.memory_space<vmem>>, vector<32x1xf32>
    %cst = arith.constant dense<0.000000e+00> : vector<32x128xf32>
    %6 = tpu.matmul %4, %3, %cst {dimension_numbers = #tpu.dot_dimension_numbers<[1], [0], [0], [1], [0, 0, 1, 1], [], []>} : vector<32x4xf32>, vector<4x128xf32>, vector<32x128xf32> -> vector<32x128xf32>
    %7 = vector.broadcast %5 : vector<32x1xf32> to vector<32x128xf32>
    %8 = arith.addf %6, %7 : vector<32x128xf32>
    %cst_5 = arith.constant 0.000000e+00 : f32
    %9 = vector.broadcast %cst_5 : f32 to vector<32x128xf32>
    %10 = arith.maximumf %8, %9 : vector<32x128xf32>
    %c32 = arith.constant 32 : index
    %c0_6 = arith.constant 0 : index
    %11 = vector.load %arg2[%c32, %c0_6] : memref<128x128xf32, #tpu.memory_space<vmem>>, vector<32x32xf32>
    %c32_7 = arith.constant 32 : index
    %c32_8 = arith.constant 32 : index
    %12 = vector.load %arg2[%c32_7, %c32_8] : memref<128x128xf32, #tpu.memory_space<vmem>>, vector<32x1xf32>
    %cst_9 = arith.constant dense<0.000000e+00> : vector<32x128xf32>
    %13 = tpu.matmul %11, %10, %cst_9 {dimension_numbers = #tpu.dot_dimension_numbers<[1], [0], [0], [1], [0, 0, 1, 1], [], []>} : vector<32x32xf32>, vector<32x128xf32>, vector<32x128xf32> -> vector<32x128xf32>
    %14 = vector.broadcast %12 : vector<32x1xf32> to vector<32x128xf32>
    %15 = arith.addf %13, %14 : vector<32x128xf32>
    %cst_10 = arith.constant 0.000000e+00 : f32
    %16 = vector.broadcast %cst_10 : f32 to vector<32x128xf32>
    %17 = arith.maximumf %15, %16 : vector<32x128xf32>
    %c64 = arith.constant 64 : index
    %c0_11 = arith.constant 0 : index
    %18 = vector.load %arg2[%c64, %c0_11] : memref<128x128xf32, #tpu.memory_space<vmem>>, vector<64x32xf32>
    %c64_12 = arith.constant 64 : index
    %c32_13 = arith.constant 32 : index
    %19 = vector.load %arg2[%c64_12, %c32_13] : memref<128x128xf32, #tpu.memory_space<vmem>>, vector<64x1xf32>
    %cst_14 = arith.constant dense<0.000000e+00> : vector<64x128xf32>
    %20 = tpu.matmul %18, %17, %cst_14 {dimension_numbers = #tpu.dot_dimension_numbers<[1], [0], [0], [1], [0, 0, 1, 1], [], []>} : vector<64x32xf32>, vector<32x128xf32>, vector<64x128xf32> -> vector<64x128xf32>
    %21 = vector.broadcast %19 : vector<64x1xf32> to vector<64x128xf32>
    %22 = arith.addf %20, %21 : vector<64x128xf32>
    %c1_i32 = arith.constant 1 : i32
    %23 = arith.cmpi ne, %arg0, %c1_i32 : i32
    %24 = arith.extui %23 : i1 to i32
    %c0_i32_15 = arith.constant 0 : i32
    %25 = arith.cmpi ne, %24, %c0_i32_15 : i32
    scf.if %25 {
      %c0_18 = arith.constant 0 : index
      %c0_19 = arith.constant 0 : index
      %29 = vector.load %arg4[%c0_18, %c0_19] : memref<64x128xf32, #tpu.memory_space<vmem>>, vector<64x128xf32>
      %30 = arith.addf %29, %22 : vector<64x128xf32>
      %c0_20 = arith.constant 0 : index
      %c0_21 = arith.constant 0 : index
      %31 = vector.load %arg4[%c0_20, %c0_21] : memref<64x128xf32, #tpu.memory_space<vmem>>, vector<64x128xf32>
      tpu.vector_store %arg4[%c0_20, %c0_21], %30 {strides = array<i32>} : memref<64x128xf32, #tpu.memory_space<vmem>>, vector<64x128xf32>,
    } else {
    }
    %c1_i32_16 = arith.constant 1 : i32
    %26 = arith.cmpi eq, %arg0, %c1_i32_16 : i32
    %27 = arith.extui %26 : i1 to i32
    %c0_i32_17 = arith.constant 0 : i32
    %28 = arith.cmpi ne, %27, %c0_i32_17 : i32
    scf.if %28 {
      %29 = tpu.iota {dimensions = array<i32: 1>} : vector<64x128xi32>
      %c128_i32 = arith.constant 128 : i32
      %30 = arith.muli %arg0, %c128_i32 : i32
      %31 = vector.broadcast %30 : i32 to vector<64x128xi32>
      %32 = arith.addi %29, %31 : vector<64x128xi32>
      %c200_i32 = arith.constant 200 : i32
      %33 = vector.broadcast %c200_i32 : i32 to vector<64x128xi32>
      %34 = arith.cmpi slt, %32, %33 : vector<64x128xi32>
      %cst_18 = arith.constant 0.000000e+00 : f32
      %35 = vector.broadcast %cst_18 : f32 to vector<64x128xf32>
      %36 = arith.select %34, %22, %35 : vector<64x128xi1>, vector<64x128xf32>
      %c0_19 = arith.constant 0 : index
      %c0_20 = arith.constant 0 : index
      %37 = vector.load %arg4[%c0_19, %c0_20] : memref<64x128xf32, #tpu.memory_space<vmem>>, vector<64x128xf32>
      %38 = arith.addf %37, %36 : vector<64x128xf32>
      %c0_21 = arith.constant 0 : index
      %c0_22 = arith.constant 0 : index
      %39 = vector.load %arg4[%c0_21, %c0_22] : memref<64x128xf32, #tpu.memory_space<vmem>>, vector<64x128xf32>
      tpu.vector_store %arg4[%c0_21, %c0_22], %38 {strides = array<i32>} : memref<64x128xf32, #tpu.memory_space<vmem>>, vector<64x128xf32>,
      %c0_23 = arith.constant 0 : index
      %c0_24 = arith.constant 0 : index
      %40 = vector.load %arg4[%c0_23, %c0_24] : memref<64x128xf32, #tpu.memory_space<vmem>>, vector<64x128xf32>
      %cst_25 = arith.constant dense<0.000000e+00> : vector<64xf32>
      %41 = vector.multi_reduction <add>, %40, %cst_25 [1] : vector<64x128xf32> to vector<64xf32>
      %42 = vector.shape_cast %41 : vector<64xf32> to vector<64x1xf32>
      %cst_26 = arith.constant 5.000000e-03 : f32
      %43 = vector.broadcast %cst_26 : f32 to vector<64x1xf32>
      %44 = arith.mulf %42, %43 : vector<64x1xf32>
      %c0_27 = arith.constant 0 : index
      %c0_28 = arith.constant 0 : index
      %45 = vector.load %arg3[%c0_27, %c0_28] : memref<64x1xf32, #tpu.memory_space<vmem>>, vector<64x1xf32>
      tpu.vector_store %arg3[%c0_27, %c0_28], %44 {strides = array<i32>} : memref<64x1xf32, #tpu.memory_space<vmem>>, vector<64x1xf32>,
    } else {
    }
    return
  }
  func.func @transform_0(%arg0: i32) -> (i32, i32) {
    %c0_i32 = arith.constant 0 : i32
    %c0_i32_0 = arith.constant 0 : i32
    return %c0_i32, %arg0 : i32, i32
  }
  func.func @transform_1(%arg0: i32) -> (i32, i32) {
    %c0_i32 = arith.constant 0 : i32
    %c0_i32_0 = arith.constant 0 : i32
    %c0_i32_1 = arith.constant 0 : i32
    return %c0_i32, %c0_i32_0 : i32, i32
  }
  func.func @transform_2(%arg0: i32) -> (i32, i32) {
    %c0_i32 = arith.constant 0 : i32
    %c0_i32_0 = arith.constant 0 : i32
    %c0_i32_1 = arith.constant 0 : i32
    return %c0_i32, %c0_i32_0 : i32, i32
  }
}

</mosaic_0001>

<bundles_post_ra>
// kernel: tpu_custom_call.1
= control target key start
LH: loop header
LB: loop body
LE: loop exit
PB: predicated region body
PF: predicated region fallthrough
CT: control target
= control target key end

     0   :  { %7 = vsyncpa [#allocation4], 0  ;;  %s1269_s0 = inlined_call_operand.hbm [shape: f32[4,256], index: 0, kind: input, shape index: {}]   ;;  %s1270_s1 = inlined_call_operand.hbm [shape: f32[128,128], index: 1, kind: input, shape index: {}]   ;;  %s1271_s2 = inlined_call_operand.vmem [shape: f32[64,1], index: 2, kind: output, shape index: {}]  }
   0x1   :  { %9 = vsyncpa [#allocation4 + $0x1], 0 }
   0x2   :  { %10 = vsyncpa [#allocation6], 0  ;;  %s1049_s9 = smov 0   ;;  %s1051_s10 = smov 0  }
   0x3   :  { %s1053_s11 = smov 0   ;;  %s1055_s12 = smov 0  }
   0x4 LB: > { %s1068_s13 = sadd.s32 4294967295, %s1025_s12   ;;  %p36_p0 = scmp.ne.s32.totalorder %s1017_s10, %s1013_s9  ;;  %s1025_s12 = sphi %s1055_s12, %s1287_s12   ;;  %s1021_s11 = sphi %s1053_s11, %s1286_s11   ;;  %s1017_s10 = sphi %s1051_s10, %s1285_s10   ;;  %s1013_s9 = sphi %s1049_s9, %s1284_s9  }
   0x5   : > { %p1272_p1 = scmp.eq.s32.totalorder %s1068_s13, 0  ;;  %p752_p2 = scmp.ge.s32.totalorder %s1025_s12, 1 }
   0x6   : > { %p89_p3 = scmp.lt.s32.totalorder %s1025_s12, 3  ;;  %s1027_s16 = smov [#allocation5]  }
   0x7   : > { %p1077_p5 = por %p1272_p1, %p36_p0  ;;  %s101_s17 = sshll.u32 %s1027_s16, 4  ;;  %s102_s17 = int_to_ptr.vmem [resolvable:$true] %s101_s17 }
   0x8   : > { %p1081_p6 = pnand %p752_p2, %p89_p3  ;;  %s1094_s19 = sadd.s32 1, %s1025_s12  }
   0x9   : > { %s1275_s14 = scalar_select %p1077_p5, 1, 0 }
   0xa   : > { %s1276_s15 = scalar_select %p1081_p6, 1, 0 }
   0xb   : > { %p876_p7 = pneg %p1081_p6  ;;  %s23_s20 = sadd.s32 1, %s1021_s11 }
   0xc   : > { %s20_s21 = ssub.s32 %s1025_s12, %s1094_s19  ;;  %s929_s24 = scalar_lea.hbm %s1270_s1, 2048 }
   0xd   : > { %p1089_p8 = pnand %p876_p7, %p1272_p1  ;;  %p930_p9 = scmp.ne.s32.totalorder %s1270_s1, %s929_s24 }
   0xe   : > { %p936_p13 = scmp.lt.u32.totalorder %s929_s24, %s1270_s1 }
   0xf   : > { %p931_p10 = pneg %p1089_p8 }
  0x11   : > { %p932_p11 = pnand %p931_p10, %p930_p9 }
  0x13   : > { %p933_p12 = pneg %p932_p11 }
  0x15   : > { %p938_p0 = pnand %p936_p13, %p933_p12 }
  0x17   : > { %941 = shalt.err (!%p938_p0)
}
  0x18   : > { %s942_s29 = scalar_lea.vmem %s102_s17, 2048  ;;  %p950_p4 = scmp.lt.s32.totalorder %s102_s17, %s102_s17 }
  0x19   : > { %p943_p2 = scmp.ne.s32.totalorder %s102_s17, %s942_s29  ;;  %p951_p1 = scmp.lt.s32.totalorder %s942_s29, %s942_s29 }
  0x1b   : > { %p945_p3 = pnand %p943_p2, %p931_p10  ;;  %p952_p5 = por %p951_p1, %p950_p4 }
  0x1d   : > { %p946_p7 = pneg %p945_p3 }
  0x1f   : > { %p953_p6 = pnand %p952_p5, %p946_p7 }
  0x21   : > { %956 = shalt.err (!%p953_p6)
}
  0x22   : > { %s1028_s30 = smov 128   ;;  %s1029_s3 = smov 8  }
  0x23   : > { %879 = dma.hbm_to_vmem [thread:$0]  (!%p1089_p8), %s1270_s1, 2048, %s102_s17, [#allocation6], %s1028_s30, %s1028_s30, %s1029_s3  }
  0x24   : > { %p21_p9 = scmp.eq.s32.totalorder %s20_s21, 0  ;;  %p30_p10 = scmp.ne.s32.totalorder %s1021_s11, %s1017_s10 }
  0x25   : > { %p31_p1 = scmp.eq.s32.totalorder %s1025_s12, 0  ;;  %p885_p4 = scmp.lt.s32.totalorder %s1025_s12, 2 }
  0x26   : > { %s1120_s6 = scalar_select %p21_p9, %s1021_s11, %s23_s20  }
  0x27   : > { %p32_p5 = por %p31_p1, %p30_p10  ;;  %s115_s7 = sand.u32 1, %s1021_s11  }
  0x28   : > { %s755_s8 = sshll.u32 %s115_s7, 2  ;;  %s756_s9 = sshll.u32 %s1025_s12, 6 }
  0x29   : > { %s1127_s23 = scalar_lea.hbm %s1269_s0, %s756_s9  ;;  %s119_s17 = scalar_lea.vmem [#allocation3], %s755_s8 }
  0x2a   : > { %s126_s18 = sshll.u32 %s119_s17, 4  ;;  %p1131_p6 = pnand %p885_p4, %p32_p5  ;;  %s1129_s18 = int_to_ptr.vmem [resolvable:$true] %s126_s18 }
  0x2b   : > { %s116_s12 = scalar_lea.sflag [#allocation4], %s115_s7  ;;  %s957_s21 = scalar_lea.hbm %s1127_s23, 64 }
  0x2c   : > { %p958_p8 = scmp.ne.s32.totalorder %s1127_s23, %s957_s21  ;;  %p959_p11 = pneg %p1131_p6 }
  0x2d   : > { %s962_s26 = scalar_lea.hbm %s1269_s0, 128  ;;  %p963_p0 = scmp.lt.u32.totalorder %s1127_s23, %s1269_s0 }
  0x2e   : > { %p960_p12 = pnand %p959_p11, %p958_p8  ;;  %p964_p2 = scmp.lt.u32.totalorder %s962_s26, %s957_s21 }
  0x2f   : > { %p966_p7 = scmp.lt.u32.totalorder %s957_s21, %s1127_s23 }
  0x30   : > { %p961_p13 = pneg %p960_p12  ;;  %p965_p3 = por %p964_p2, %p963_p0 }
  0x32   : > { %p967_p9 = por %p966_p7, %p965_p3 }
  0x34   : > { %p968_p10 = pnand %p967_p9, %p961_p13 }
  0x36   : > { %971 = shalt.err (!%p968_p10)
}
  0x37   : > { %s972_s29 = scalar_lea.vmem %s1129_s18, 64  ;;  %s1030_s30 = smov [#allocation3]  }
  0x38   : > { %p973_p1 = scmp.ne.s32.totalorder %s1129_s18, %s972_s29  ;;  %s977_s3 = sshll.u32 %s1030_s30, 4  ;;  %s978_s3 = int_to_ptr.vmem [resolvable:$false] %s977_s3 }
  0x39   : > { %s979_s4 = scalar_lea.vmem %s978_s3, 128  ;;  %p980_p8 = scmp.lt.s32.totalorder %s1129_s18, %s978_s3 }
  0x3a   : > { %p975_p4 = pnand %p973_p1, %p959_p11  ;;  %p981_p12 = scmp.lt.s32.totalorder %s979_s4, %s972_s29 }
  0x3c   : > { %p976_p5 = pneg %p975_p4  ;;  %p982_p0 = por %p981_p12, %p980_p8 }
  0x3e   : > { %p983_p2 = pnand %p982_p0, %p976_p5 }
  0x40   : > { %986 = shalt.err (!%p983_p2)
}
  0x41   : > { %883 = dma.hbm_to_vmem [thread:$0]  (!%p1131_p6), %s1127_s23, 64, %s1129_s18, %s116_s12  }
  0x42   : > { %p1279_p13 = scmp.ne.s32.totalorder %s1276_s15, 0 }
  0x43   : > { %s137_s5 = sand.u32 (!%p1279_p13), 1, %s1017_s10   ;;  %p1280_p11 = scmp.ne.s32.totalorder (!%p1279_p13), %s1275_s14, 0 }
  0x44   : > { %135 = sbr.rel (%p1279_p13) target bundleno = 939 (0x3ab), region = 28  ;;  %s758_s7 = sshll.u32 (!%p1279_p13), %s137_s5, 2 }
  0x45   : > { %s138_s8 = scalar_lea.sflag (!%p1279_p13), [#allocation4], %s137_s5  ;;  %s141_s9 = scalar_lea.vmem (!%p1279_p13), [#allocation3], %s758_s7 }
  0x4b   : > { %1004 = dma.done.wait (%p1280_p11), %s138_s8, 64  }
  0x4c   : > { %1006 = vsyncadd (%p1280_p11), %s138_s8, 4294967232  ;;  %p1281_p3 = scmp.eq.s32.totalorder %s1068_s13, 0 }
  0x4e   : > { %1008 = dma.done.wait (%p1281_p3), [#allocation6], 2048   ;;  %p1282_p7 = pmov %p1281_p3 }
  0x4f   : > { %p1283_p6 = scmp.ne.s32.totalorder %s1068_s13, 0 }
  0x50   : > { %1010 = vsyncadd (%p1282_p7), [#allocation6], 4294965248  ;;  %v1031_v0 = vmov (!%p1283_p6), 0.0  }
  0x51   : > { %164 = sbr.rel (%p1283_p6) target bundleno = 88 (0x58), region = 40  ;;  %165 = vst [vmem:[#allocation2] sm:$0xff] (!%p1283_p6), %v1031_v0  ;;  %166 = vst [vmem:[#allocation2 + $0x8] sm:$0xff] (!%p1283_p6), %v1031_v0 }
  0x52   : > { %167 = vst [vmem:[#allocation2 + $0x10] sm:$0xff] (!%p1283_p6), %v1031_v0  ;;  %168 = vst [vmem:[#allocation2 + $0x18] sm:$0xff] (!%p1283_p6), %v1031_v0 }
  0x53   : > { %169 = vst [vmem:[#allocation2 + $0x20] sm:$0xff] (!%p1283_p6), %v1031_v0  ;;  %170 = vst [vmem:[#allocation2 + $0x28] sm:$0xff] (!%p1283_p6), %v1031_v0 }
  0x54   : > { %171 = vst [vmem:[#allocation2 + $0x30] sm:$0xff] (!%p1283_p6), %v1031_v0  ;;  %172 = vst [vmem:[#allocation2 + $0x38] sm:$0xff] (!%p1283_p6), %v1031_v0 }
  0x58 PF: > { %v173_v1 = vld [vmem:[%s141_s9] sm:$0xf]  ;;  %vm207_vm0 = vcmask 1043456   ;;  %v174_v2 = vld [vmem:[#allocation5] sm:$0xff]  ;;  %vm198_vm1 = vcmask 31744   ;;  %v175_v3 = vld [vmem:[#allocation5 + $0x8] sm:$0xff] }
  0x59   : > { %808 = vmatprep.subr.msk.mxu0 %vm207_vm0, %v173_v1  ;;  %810 = vmatprep.mubr.msk.f32.mxu0 %vm198_vm1, %v174_v2  ;;  %v176_v4 = vld [vmem:[#allocation5 + $0x10] sm:$0xff]  ;;  %v1032_v5 = vmov 4   ;;  %v177_v6 = vld [vmem:[#allocation5 + $0x18] sm:$0xff]  ;;  %v300_v7 = vld [vmem:[#allocation5 + $0x20] sm:$0xff]  ;;  %vm324_vm2 = vcmask 261120   ;;  %v1033_v9 = vmov 32  }
  0x5a   : > { %809 = vmatpush3.msk.msra.mxu0 %vm207_vm0, %v173_v1  ;;  %925 = vset.pattern.permute.xlu0 %v1032_v5  ;;  %v301_v8 = vld [vmem:[#allocation5 + $0x28] sm:$0xff]  ;;  %v422_v10 = vld [vmem:[#allocation5 + $0x40] sm:$0xff]  ;;  %v302_v11 = vld [vmem:[#allocation5 + $0x30] sm:$0xff]  ;;  %p778_p9 = scmp.eq.s32.totalorder %s1068_s13, 1 }
  0x5b   : > { %811 = vmatmul.mubr.msk.f32.vlgmr.msra.gmra.mrb[0].mxu0 %vm198_vm1, %v175_v3  ;;  %180 = vperm.xlu0 %925, %v174_v2   ;;  %v303_v12 = vld [vmem:[#allocation5 + $0x38] sm:$0xff]  ;;  %v1175_v13 = vld [vmem:[#allocation5 + $0x48] sm:$0xff]  ;;  %v1178_v14 = vld [vmem:[#allocation5 + $0x50] sm:$0xff] }
  0x5c   : > { %813 = vmatprep.mubr.msk.f32.mxu0 %vm198_vm1, %v176_v4  ;;  %926 = vset.pattern.permute.xlu1 %v1032_v5  ;;  %v1180_v15 = vld [vmem:[#allocation5 + $0x58] sm:$0xff]  ;;  %v1184_v16 = vld [vmem:[#allocation5 + $0x60] sm:$0xff]  ;;  %v1186_v17 = vld [vmem:[#allocation5 + $0x68] sm:$0xff] }
  0x5d   : > { %190 = vperm.xlu1 %926, %v176_v4   ;;  %824 = vmatprep.mubr.msk.f32.mxu1 %vm324_vm2, %v300_v7  ;;  %v428_v18 = vld [vmem:[#allocation5 + $0x70] sm:$0xff]  ;;  %v429_v19 = vld [vmem:[#allocation5 + $0x78] sm:$0xff] }
  0x5f   : > { %814 = vmatmul.mubr.msk.f32.gmra.mrb[2].mxu0 %vm198_vm1, %v177_v6  ;;  %185 = vperm.xlu0 %925, %v175_v3  }
  0x60   : > { %838 = vmatprep.mubr.msk.f32.mxu0 %vm324_vm2, %v422_v10 }
  0x61   : > { %195 = vperm.xlu1 %926, %v177_v6  }
  0x63   : > { %927 = vset.pattern.permute.xlu0 %v1033_v9 }
  0x64   : > { %306 = vperm.xlu0 %927, %v300_v7  }
  0x65   : > { %928 = vset.pattern.permute.xlu1 %v1033_v9 }
  0x66   : > { %311 = vperm.xlu1 %928, %v301_v8  }
  0x68   : > { %321 = vperm.xlu0 %927, %v303_v12  }
  0x6a   : > { %316 = vperm.xlu1 %928, %v302_v11  }
  0x6c   : > { %437 = vperm.xlu0 %927, %v1175_v13  }
  0x6e   : > { %432 = vperm.xlu1 %928, %v422_v10  }
  0x70   : > { %447 = vperm.xlu0 %927, %v1180_v15  }
  0x72   : > { %442 = vperm.xlu1 %928, %v1178_v14  }
  0x74   : > { %457 = vperm.xlu0 %927, %v1186_v17  }
  0x76   : > { %452 = vperm.xlu1 %928, %v1184_v16  }
  0x78   : > { %467 = vperm.xlu0 %927, %v429_v19  }
  0x7a   : > { %462 = vperm.xlu1 %928, %v428_v18  }
  0xda   : > { %v181_v20 = vpop.permute.xlu0 %180 }
  0xdc   : > { %v191_v21 = vpop.permute.xlu1 %190 }
  0xde   : > { %v186_v22 = vpop.permute.xlu0 %185 }
  0xe0   : > { %v196_v28 = vpop.permute.xlu1 %195 }
  0xe3   : > { %v307_v38 = vpop.permute.xlu0 %306 }
  0xe5   : > { %v312_v39 = vpop.permute.xlu1 %311 }
  0xe7   : > { %v322_v45 = vpop.permute.xlu0 %321 }
  0xe9   : > { %v317_v48 = vpop.permute.xlu1 %316 }
  0xeb   : > { %v438_v57 = vpop.permute.xlu0 %437 }
  0xed   : > { %v433_v56 = vpop.permute.xlu1 %432 }
  0xef   : > { %v448_v59 = vpop.permute.xlu0 %447 }
  0xf1   : > { %v443_v58 = vpop.permute.xlu1 %442 }
  0xf3   : > { %v458_v61 = vpop.permute.xlu0 %457 }
  0xf5   : > { %v453_v60 = vpop.permute.xlu1 %452 }
  0xf7   : > { %v468_v63 = vpop.permute.xlu0 %467 }
  0xf9   : > { %v463_v62 = vpop.permute.xlu1 %462 }
 0x12e   : > { %v812_v23 = vpop.f32.mrb[0].mxu0 }
 0x12f   : > { %v283_v24 = vadd.f32 %v812_v23, %v186_v22  ;;  %v277_v25 = vpop.f32.mrb[1].mxu0  ;;  %v598_v22 = vld [vmem:[#allocation2 + $0x18] sm:$0xff] (!%p778_p9)  ;;  %v599_v23 = vld [vmem:[#allocation2 + $0x20] sm:$0xff] (!%p778_p9) }
 0x130   : > { %v278_v26 = vadd.f32 %v277_v25, %v181_v20 }
 0x131   : > { %v297_v27 = vmax.f32 %v283_v24, 0.0  ;;  %v600_v24 = vld [vmem:[#allocation2 + $0x28] sm:$0xff] (!%p778_p9) }
 0x132   : > { %v296_v29 = vmax.f32 %v278_v26, 0.0  ;;  %v815_v30 = vpop.f32.mrb[2].mxu0 }
 0x133   : > { %v293_v31 = vadd.f32 %v815_v30, %v196_v28  ;;  %v287_v32 = vpop.f32.mrb[3].mxu0  ;;  %v601_v28 = vld [vmem:[#allocation2 + $0x30] sm:$0xff] (!%p778_p9) }
 0x134   : > { %v288_v33 = vadd.f32 %v287_v32, %v191_v21  ;;  %v850_v34 = vpack.c.bf16 %v297_v27, %v296_v29  ;;  %v602_v29 = vld [vmem:[#allocation2 + $0x38] sm:$0xff] (!%p778_p9) }
 0x135   : > { %v299_v35 = vmax.f32 %v293_v31, 0.0 }
 0x136   : > { %v298_v36 = vmax.f32 %v288_v33, 0.0  ;;  %851 = vmatprep.subr.bf16.mxu1 %v850_v34 }
 0x137   : > { %853 = vmatpush3.bf16.msra.mxu1 %v850_v34 }
 0x138   : > { %v854_v37 = vpack.c.bf16 %v299_v35, %v298_v36 }
 0x13a   : > { %855 = vmatprep.subr.bf16.mxu1 %v854_v37 }
 0x13b   : > { %857 = vmatpush3.bf16.msra.mxu1 %v854_v37 }
 0x13e   : > { %825 = vmatmul.mubr.msk.f32.vlgmr.msra.gmra.mrb[0].mxu1 %vm324_vm2, %v301_v8 }
 0x13f   : > { %827 = vmatprep.mubr.msk.f32.mxu1 %vm324_vm2, %v302_v11 }
 0x142   : > { %828 = vmatmul.mubr.msk.f32.gmra.mrb[2].mxu1 %vm324_vm2, %v303_v12 }
 0x143   : > { %847 = vmatprep.mubr.msk.f32.mxu1 %vm324_vm2, %v428_v18  ;;  %v597_v18 = vld [vmem:[#allocation2 + $0x10] sm:$0xff] (!%p778_p9) }
 0x211   : > { %v826_v40 = vpop.f32.mrb[0].mxu1 }
 0x212   : > { %v405_v41 = vadd.f32 %v826_v40, %v312_v39  ;;  %v399_v42 = vpop.f32.mrb[1].mxu1 }
 0x213   : > { %v400_v43 = vadd.f32 %v399_v42, %v307_v38 }
 0x214   : > { %v419_v44 = vmax.f32 %v405_v41, 0.0 }
 0x215   : > { %v418_v46 = vmax.f32 %v400_v43, 0.0  ;;  %v829_v47 = vpop.f32.mrb[2].mxu1 }
 0x216   : > { %v415_v49 = vadd.f32 %v829_v47, %v322_v45  ;;  %v409_v50 = vpop.f32.mrb[3].mxu1 }
 0x217   : > { %v858_v51 = vpack.c.bf16 %v419_v44, %v418_v46  ;;  %v410_v52 = vadd.f32 %v409_v50, %v317_v48 }
 0x218   : > { %v421_v53 = vmax.f32 %v415_v49, 0.0 }
 0x219   : > { %v420_v54 = vmax.f32 %v410_v52, 0.0  ;;  %859 = vmatprep.subr.bf16.mxu0 %v858_v51  ;;  %866 = vmatprep.subr.bf16.mxu1 %v858_v51 }
 0x21a   : > { %861 = vmatpush3.bf16.msra.mxu0 %v858_v51  ;;  %868 = vmatpush3.bf16.msra.mxu1 %v858_v51 }
 0x21b   : > { %v862_v55 = vpack.c.bf16 %v421_v53, %v420_v54 }
 0x21d   : > { %863 = vmatprep.subr.bf16.mxu0 %v862_v55  ;;  %867 = vmatprep.subr.bf16.mxu1 %v862_v55 }
 0x21e   : > { %865 = vmatpush3.bf16.msra.mxu0 %v862_v55  ;;  %869 = vmatpush3.bf16.msra.mxu1 %v862_v55 }
 0x221   : > { %839 = vmatmul.mubr.msk.f32.vlgmr.msra.gmra.mrb[4].mxu0 %vm324_vm2, %v1175_v13  ;;  %848 = vmatmul.mubr.msk.f32.vlgmr.msra.gmra.mrb[4].mxu1 %vm324_vm2, %v429_v19 }
 0x222   : > { %841 = vmatprep.mubr.msk.f32.mxu0 %vm324_vm2, %v1178_v14 }
 0x225   : > { %842 = vmatmul.mubr.msk.f32.gmra.mrb[6].mxu0 %vm324_vm2, %v1180_v15 }
 0x226   : > { %844 = vmatprep.mubr.msk.f32.mxu0 %vm324_vm2, %v1184_v16  ;;  %v595_v16 = vld [vmem:[#allocation2] sm:$0xff] (!%p778_p9) }
 0x229   : > { %845 = vmatmul.mubr.msk.f32.gmra.mrb[8].mxu0 %vm324_vm2, %v1186_v17  ;;  %v596_v17 = vld [vmem:[#allocation2 + $0x8] sm:$0xff] (!%p778_p9) }
 0x2f4   : > { %v840_v0 = vpop.f32.mrb[4].mxu0  ;;  %v849_v1 = vpop.f32.mrb[4].mxu1 }
 0x2f5   : > { %v558_v2 = vadd.f32 %v840_v0, %v438_v57  ;;  %v1205_v3 = vadd.f32 %v849_v1, %v468_v63  ;;  %v552_v4 = vpop.f32.mrb[5].mxu0  ;;  %v582_v5 = vpop.f32.mrb[5].mxu1 }
 0x2f6   : > { %v553_v6 = vadd.f32 %v552_v4, %v433_v56  ;;  %v1207_v7 = vadd.f32 %v582_v5, %v463_v62 }
 0x2f7   : > { %v604_v20 = vadd.f32 (!%p778_p9), %v596_v17, %v558_v2  ;;  %v610_v31 = vadd.f32 (!%p778_p9), %v602_v29, %v1205_v3 }
 0x2f8   : > { %v843_v8 = vpop.f32.mrb[6].mxu0  ;;  %594 = sbr.rel (%p778_p9) target bundleno = 771 (0x303), region = 44  ;;  %v603_v19 = vadd.f32 (!%p778_p9), %v595_v16, %v553_v6  ;;  %v609_v30 = vadd.f32 (!%p778_p9), %v601_v28, %v1207_v7 }
 0x2f9   : > { %v568_v9 = vadd.f32 %v843_v8, %v448_v59  ;;  %v562_v10 = vpop.f32.mrb[7].mxu0  ;;  %612 = vst [vmem:[#allocation2 + $0x8] sm:$0xff] (!%p778_p9), %v604_v20  ;;  %618 = vst [vmem:[#allocation2 + $0x38] sm:$0xff] (!%p778_p9), %v610_v31 }
 0x2fa   : > { %v563_v11 = vadd.f32 %v562_v10, %v443_v58  ;;  %611 = vst [vmem:[#allocation2] sm:$0xff] (!%p778_p9), %v603_v19  ;;  %617 = vst [vmem:[#allocation2 + $0x30] sm:$0xff] (!%p778_p9), %v609_v30 }
 0x2fb   : > { %v606_v25 = vadd.f32 (!%p778_p9), %v598_v22, %v568_v9 }
 0x2fc   : > { %v846_v12 = vpop.f32.mrb[8].mxu0  ;;  %v605_v21 = vadd.f32 (!%p778_p9), %v597_v18, %v563_v11 }
 0x2fd   : > { %v578_v13 = vadd.f32 %v846_v12, %v458_v61  ;;  %v572_v14 = vpop.f32.mrb[9].mxu0  ;;  %614 = vst [vmem:[#allocation2 + $0x18] sm:$0xff] (!%p778_p9), %v606_v25 }
 0x2fe   : > { %v573_v15 = vadd.f32 %v572_v14, %v453_v60  ;;  %613 = vst [vmem:[#allocation2 + $0x10] sm:$0xff] (!%p778_p9), %v605_v21 }
 0x2ff   : > { %v608_v27 = vadd.f32 %v600_v24, %v578_v13 }
 0x300   : > { %v607_v26 = vadd.f32 %v599_v23, %v573_v15 }
 0x301   : > { %616 = vst [vmem:[#allocation2 + $0x28] sm:$0xff] %v608_v27 }
 0x302   : > { %615 = vst [vmem:[#allocation2 + $0x20] sm:$0xff] %v607_v26 }
 0x303 PF: > { %p779_p10 = scmp.ne.s32.totalorder %s1068_s13, 1 }
 0x304   : > { %v623_v32 = vlaneseq (!%p779_p10)  ;;  %s780_s14 = sshll.u32 (!%p779_p10), %s1068_s13, 7  ;;  %v638_v39 = vld [vmem:[#allocation2 + $0x8] sm:$0xff] (!%p779_p10)  ;;  %v644_v46 = vld [vmem:[#allocation2 + $0x38] sm:$0xff] (!%p779_p10)  ;;  %vm693_vm4 = vcmask (!%p779_p10), 7168  }
 0x305   : > { %622 = sbr.rel (%p779_p10) target bundleno = 939 (0x3ab), region = 48  ;;  %v626_v33 = vstv (!%p779_p10), %s780_s14  ;;  %v637_v37 = vld [vmem:[#allocation2] sm:$0xff] (!%p779_p10)  ;;  %v643_v51 = vld [vmem:[#allocation2 + $0x30] sm:$0xff] (!%p779_p10) }
 0x306   : > { %v624_v34 = vand.u32 (!%p779_p10), 127, %v623_v32 }
 0x308   : > { %v627_v35 = vadd.s32 (!%p779_p10), %v626_v33, %v624_v34  ;;  %v640_v38 = vld [vmem:[#allocation2 + $0x18] sm:$0xff] (!%p779_p10)  ;;  %v642_v40 = vld [vmem:[#allocation2 + $0x28] sm:$0xff] (!%p779_p10) }
 0x309   : > { %v639_v36 = vld [vmem:[#allocation2 + $0x10] sm:$0xff] (!%p779_p10)  ;;  %v641_v45 = vld [vmem:[#allocation2 + $0x20] sm:$0xff] (!%p779_p10) }
 0x30a   : > { %vm628_vm3 = vcmp.lt.s32.totalorder (!%p779_p10), %v627_v35, 200 }
 0x30b   : > { %v631_v41 = vsel (!%p779_p10), %vm628_vm3, %v563_v11, 0.0  ;;  %v629_v42 = vsel (!%p779_p10), %vm628_vm3, %v553_v6, 0.0  ;;  %v632_v43 = vsel (!%p779_p10), %vm628_vm3, %v568_v9, 0.0  ;;  %v630_v44 = vsel (!%p779_p10), %vm628_vm3, %v558_v2, 0.0 }
 0x30c   : > { %v647_v47 = vadd.f32 %v639_v36, %v631_v41  ;;  %v645_v48 = vadd.f32 %v637_v37, %v629_v42  ;;  %v648_v49 = vadd.f32 %v640_v38, %v632_v43  ;;  %v646_v50 = vadd.f32 %v638_v39, %v630_v44 }
 0x30d   : > { %v634_v52 = vsel %vm628_vm3, %v578_v13, 0.0  ;;  %v633_v53 = vsel %vm628_vm3, %v573_v15, 0.0  ;;  %v636_v54 = vsel %vm628_vm3, %v1205_v3, 0.0  ;;  %v635_v55 = vsel %vm628_vm3, %v1207_v7, 0.0 }
 0x30e   : > { %655 = vst [vmem:[#allocation2 + $0x10] sm:$0xff] %v647_v47  ;;  %673 = vadd.xlane.f32.xlu1 %v647_v47  ;;  %653 = vst [vmem:[#allocation2] sm:$0xff] %v645_v48  ;;  %669 = vadd.xlane.f32.xlu0 %v645_v48  ;;  %v650_v56 = vadd.f32 %v642_v40, %v634_v52  ;;  %v649_v57 = vadd.f32 %v641_v45, %v633_v53 }
 0x30f   : > { %656 = vst [vmem:[#allocation2 + $0x18] sm:$0xff] %v648_v49  ;;  %654 = vst [vmem:[#allocation2 + $0x8] sm:$0xff] %v646_v50  ;;  %v652_v58 = vadd.f32 %v644_v46, %v636_v54  ;;  %v651_v59 = vadd.f32 %v643_v51, %v635_v55 }
 0x310   : > { %658 = vst [vmem:[#allocation2 + $0x28] sm:$0xff] %v650_v56  ;;  %657 = vst [vmem:[#allocation2 + $0x20] sm:$0xff] %v649_v57 }
 0x311   : > { %660 = vst [vmem:[#allocation2 + $0x38] sm:$0xff] %v652_v58  ;;  %659 = vst [vmem:[#allocation2 + $0x30] sm:$0xff] %v651_v59 }
 0x312   : > { %675 = vadd.xlane.f32.xlu1 %v648_v49  ;;  %671 = vadd.xlane.f32.xlu0 %v646_v50 }
 0x316   : > { %679 = vadd.xlane.f32.xlu1 %v650_v56  ;;  %677 = vadd.xlane.f32.xlu0 %v649_v57 }
 0x31a   : > { %683 = vadd.xlane.f32.xlu1 %v652_v58  ;;  %681 = vadd.xlane.f32.xlu0 %v651_v59 }
 0x39b   : > { %v674_v60 = vpop.xlane.xlu1 %673  ;;  %v670_v61 = vpop.xlane.xlu0 %669 }
 0x39c   : > { %v687_v62 = vmul.f32 0.005, %v674_v60  ;;  %v685_v63 = vmul.f32 0.005, %v670_v61 }
 0x39e   : > { %696 = vst.msk [vmem:[%s1271_s2 + $0x10] sm:$0xff] %vm693_vm4, %v687_v62  ;;  %694 = vst.msk [vmem:[%s1271_s2] sm:$0xff] %vm693_vm4, %v685_v63 }
 0x39f   : > { %v676_v0 = vpop.xlane.xlu1 %675  ;;  %v672_v1 = vpop.xlane.xlu0 %671 }
 0x3a0   : > { %v688_v2 = vmul.f32 0.005, %v676_v0  ;;  %v686_v3 = vmul.f32 0.005, %v672_v1 }
 0x3a2   : > { %697 = vst.msk [vmem:[%s1271_s2 + $0x18] sm:$0xff] %vm693_vm4, %v688_v2  ;;  %695 = vst.msk [vmem:[%s1271_s2 + $0x8] sm:$0xff] %vm693_vm4, %v686_v3 }
 0x3a3   : > { %v680_v4 = vpop.xlane.xlu1 %679  ;;  %v678_v5 = vpop.xlane.xlu0 %677 }
 0x3a4   : > { %v690_v6 = vmul.f32 0.005, %v680_v4  ;;  %v689_v7 = vmul.f32 0.005, %v678_v5 }
 0x3a6   : > { %699 = vst.msk [vmem:[%s1271_s2 + $0x28] sm:$0xff] %vm693_vm4, %v690_v6  ;;  %698 = vst.msk [vmem:[%s1271_s2 + $0x20] sm:$0xff] %vm693_vm4, %v689_v7 }
 0x3a7   : > { %v684_v8 = vpop.xlane.xlu1 %683  ;;  %v682_v9 = vpop.xlane.xlu0 %681 }
 0x3a8   : > { %v692_v10 = vmul.f32 0.005, %v684_v8  ;;  %v691_v11 = vmul.f32 0.005, %v682_v9 }
 0x3aa   : > { %701 = vst.msk [vmem:[%s1271_s2 + $0x38] sm:$0xff] %vm693_vm4, %v692_v10  ;;  %700 = vst.msk [vmem:[%s1271_s2 + $0x30] sm:$0xff] %vm693_vm4, %v691_v11 }
 0x3ab PF: > { %p13_p1 = scmp.ge.s32.totalorder %s1094_s19, 4   ;;  %s1284_s9 = smov %s1017_s10 }
 0x3ac   : > { %s1285_s10 = smov %s1021_s11  ;;  %s1286_s11 = smov %s1120_s6 }
 0x3ad   : > { %s1287_s12 = smov %s1094_s19  ;;  %15 = sbr.rel (!%p13_p1) target bundleno = 4 (0x4), region = 80 }
 0x3b4   :  { %713 = vsyncpa [#allocation4], 1 }
 0x3b5   :  { %715 = vsyncpa [#allocation4 + $0x1], 1 }
 0x3b6   :  { %716 = vsyncpa [#allocation6], 1 }

</bundles_post_ra>
